<compile_context>
chip_gen: v5e
topology: v5e:2x2
jax: 0.10.0
libtpu: 0.0.40
codegen_flags: <defaults>
</compile_context>

<pallas_src>
import jax
import jax.numpy as jnp
from jax import lax
from jax.experimental import pallas as pl
from jax.experimental.pallas import tpu as pltpu

IGNORE_LABEL = -1        # ignore_label of the PyTorch module
WEIGHT = 1.0             # weight of the PyTorch module (None -> 1.0)

LANES = 128
SUBLANES = 8
TB_MAX = 256             # max rows per block (sublane axis)
TN_MAX = 4096            # max features per block (lane axis)
VMEM_LIMIT_BYTES = 40 * 1024 * 1024


def _cdiv(a, b):
    return (a + b - 1) // b


def _round_up(x, m):
    return _cdiv(x, m) * m


def _sublane_req(dtype):
    # f32 -> 8 sublanes, bf16 -> 16, int8 -> 32 (packed sublane tiling).
    return SUBLANES * max(1, 4 // jnp.dtype(dtype).itemsize)


def _make_sbce_kernel(tb, tn, cw, n_chunks, nr, needs_col_mask):
    def kernel(pred_ref, label_ref, out_ref):
        # Zero the resident (tb, cw) partial-sum accumulator at the start of the
        # reduction (feature) grid axis.
        @pl.when(pl.program_id(1) == 0)
        def _():
            out_ref[...] = jnp.zeros_like(out_ref)

        if needs_col_mask:
            k = pl.program_id(1)
            lane = lax.broadcasted_iota(jnp.int32, (tb, cw), 1)

        # Ignore-label compare in the label's native dtype (f32 / bf16 / int8).
        ignore = jnp.asarray(IGNORE_LABEL, dtype=label_ref.dtype)

        partial = None
        for c in range(n_chunks):
            sl = slice(c * cw, (c + 1) * cw)
            x = pred_ref[:, sl].astype(jnp.float32)
            z = label_ref[:, sl]
            valid = z != ignore
            if needs_col_mask:
                # Mask the ragged feature tail of the last k block (scalar limit,
                # so it is a single VPU compare per chunk).
                valid = jnp.logical_and(valid, lane < (nr - k * tn - c * cw))
            zf = z.astype(jnp.float32)
            # Numerically stable BCE-with-logits:
            #   relu(x) - x*z + softplus(-|x|),  softplus(-|x|) = log1p(exp(-|x|))
            bce = (jnp.maximum(x, 0.0) - x * zf
                   + jnp.log1p(jnp.exp(-jnp.abs(x))))
            loss_c = jnp.where(valid, bce, 0.0)
            if WEIGHT != 1.0:
                loss_c = loss_c * WEIGHT
            partial = loss_c if partial is None else partial + loss_c

        out_ref[...] += partial

    return kernel


def sigmoid_bce_loss(pred, label):
    """pred, label: equal-sized arrays with leading batch dim. Returns (B,) loss."""
    B = pred.shape[0]
    N = 1
    for d in pred.shape[1:]:
        N *= int(d)
    label = label.reshape(pred.shape)        # torch: label.view(pred.size())

    # Spread each sample's features over the largest divisor of N in {8,4,2,1}
    # rows so small batches still fill the (8, 128) vreg sublanes.
    sub = max(d for d in (8, 4, 2, 1) if N % d == 0)
    rows = B * sub
    nr = N // sub

    pred2d = pred.reshape(rows, nr)
    label2d = label.reshape(rows, nr)

    sub_req = max(_sublane_req(pred2d.dtype), _sublane_req(label2d.dtype))

    # Row-block size (never exceeds the array extent; ragged tails are partial
    # blocks whose garbage rows are never written back).
    if rows % sub_req == 0 or rows > TB_MAX:
        tb = min(TB_MAX, _round_up(rows, sub_req))
        # v7x megacore: give the "parallel" axis >= 2 blocks when possible.
        if _cdiv(rows, tb) < 2 and rows >= 2 * sub_req:
            tb = _round_up(_cdiv(rows, 2), sub_req)
    else:
        tb = rows                            # single full-extent row block

    # Feature-block size: multiple of 128 that is <= nr, or the full extent.
    if nr >= LANES:
        tn = min(TN_MAX, (nr // LANES) * LANES)
    else:
        tn = nr
    cw = min(LANES, tn)
    n_chunks = tn // cw
    needs_col_mask = (nr % tn) != 0          # ragged tail in the last k block

    grid = (_cdiv(rows, tb), _cdiv(nr, tn))  # reduction (feature) axis last

    in_bytes = (pred2d.size * pred2d.dtype.itemsize
                + label2d.size * label2d.dtype.itemsize)
    cost = pl.CostEstimate(
        flops=8 * rows * nr,
        transcendentals=2 * rows * nr,
        bytes_accessed=int(in_bytes) + rows * cw * 4,
    )

    partials = pl.pallas_call(
        _make_sbce_kernel(tb, tn, cw, n_chunks, nr, needs_col_mask),
        out_shape=jax.ShapeDtypeStruct((rows, cw), jnp.float32),
        grid=grid,
        in_specs=[
            pl.BlockSpec((tb, tn), lambda i, k: (i, k)),
            pl.BlockSpec((tb, tn), lambda i, k: (i, k)),
        ],
        out_specs=pl.BlockSpec((tb, cw), lambda i, k: (i, 0)),
        compiler_params=pltpu.CompilerParams(
            dimension_semantics=("parallel", "arbitrary"),
            vmem_limit_bytes=VMEM_LIMIT_BYTES,
        ),
        cost_estimate=cost,
    )(pred2d, label2d)

    # Finish the mean: per-sample sum of its (sub, cw) partials divided by the
    # full per-sample element count (PyTorch averages over all non-batch dims,
    # ignored positions included).
    per_sample = partials.reshape(B, sub * cw).sum(axis=-1)
    return per_sample * (1.0 / N)


def _reference(pred, label):
    B = pred.shape[0]
    p = pred.reshape(B, -1).astype(jnp.float32)
    l = label.reshape(B, -1)
    sw = (l != jnp.asarray(IGNORE_LABEL, l.dtype)).astype(jnp.float32)
    lf = l.astype(jnp.float32) * sw
    loss = jnp.maximum(p, 0.0) - p * lf + jnp.log1p(jnp.exp(-jnp.abs(p)))
    loss = WEIGHT * (loss * sw)
    return jnp.mean(loss, axis=-1)


if __name__ == "__main__":
    key = jax.random.PRNGKey(0)

    def make_inputs(k, shape, pred_dtype, label_dtype):
        k1, k2, k3 = jax.random.split(k, 3)
        pred = jax.random.normal(k1, shape, dtype=jnp.float32).astype(pred_dtype)
        lab = jax.random.bernoulli(k2, 0.5, shape).astype(jnp.int32)
        ign = jax.random.bernoulli(k3, 0.1, shape)
        label = jnp.where(ign, -1, lab).astype(label_dtype)
        return pred, label

    cases = [
        ((2, 4, 16, 16), jnp.float32, jnp.float32),   # main shape, fully aligned
        ((2, 3, 5, 7), jnp.float32, jnp.float32),     # tiny / odd N, single full block
        ((2, 5, 16, 16), jnp.float32, jnp.float32),   # ragged feature tail (in-kernel mask)
        ((2, 9, 64, 64), jnp.float32, jnp.float32),   # multi-chunk fold + ragged tail
        ((4, 8, 16, 16), jnp.bfloat16, jnp.int8),     # narrow HBM streams (bf16 pred, int8 label)
    ]
    keys = jax.random.split(key, len(cases))
    for kk, (shape, pdt, ldt) in zip(keys, cases):
        pred, label = make_inputs(kk, shape, pdt, ldt)
        out = jax.block_until_ready(sigmoid_bce_loss(pred, label))
        ref = _reference(pred, label)
        assert out.shape == (shape[0],)
        assert jnp.allclose(out, ref, atol=1e-4, rtol=1e-4), (shape, out, ref)
    print("KERNEL_OK")
</pallas_src>

<mosaic_0001>
module attributes {stable_mosaic.version = 11 : i64} {
  func.func @kernel(%arg0: i32, %arg1: i32, %arg2: memref<8x128xf32, #tpu.memory_space<vmem>>, %arg3: memref<8x128xf32, #tpu.memory_space<vmem>>, %arg4: memref<8x128xf32, #tpu.memory_space<vmem>>) attributes {dimension_semantics = [#tpu.dimension_semantics<parallel>, #tpu.dimension_semantics<arbitrary>], iteration_bounds = array<i64: 2, 1>, scalar_prefetch = 0 : i64, scratch_operands = 0 : i64, tpu.core_type = #tpu.core_type<tc>, window_params = [{transform_indices = @transform_0, window_bounds = array<i64: 8, 128>}, {transform_indices = @transform_1, window_bounds = array<i64: 8, 128>}, {transform_indices = @transform_2, window_bounds = array<i64: 8, 128>}]} {
    %c0_i32 = arith.constant 0 : i32
    %0 = arith.cmpi eq, %arg1, %c0_i32 : i32
    %1 = arith.extui %0 : i1 to i32
    %c0_i32_0 = arith.constant 0 : i32
    %2 = arith.cmpi ne, %1, %c0_i32_0 : i32
    scf.if %2 {
      %cst_11 = arith.constant 0.000000e+00 : f32
      %22 = vector.broadcast %cst_11 : f32 to vector<8x128xf32>
      %c0_12 = arith.constant 0 : index
      %c0_13 = arith.constant 0 : index
      %23 = vector.load %arg4[%c0_12, %c0_13] : memref<8x128xf32, #tpu.memory_space<vmem>>, vector<8x128xf32>
      tpu.vector_store %arg4[%c0_12, %c0_13], %22 {strides = array<i32>} : memref<8x128xf32, #tpu.memory_space<vmem>>, vector<8x128xf32>,
    } else {
    }
    %c0 = arith.constant 0 : index
    %c0_1 = arith.constant 0 : index
    %3 = vector.load %arg2[%c0, %c0_1] : memref<8x128xf32, #tpu.memory_space<vmem>>, vector<8x128xf32>
    %c0_2 = arith.constant 0 : index
    %c0_3 = arith.constant 0 : index
    %4 = vector.load %arg3[%c0_2, %c0_3] : memref<8x128xf32, #tpu.memory_space<vmem>>, vector<8x128xf32>
    %cst = arith.constant -1.000000e+00 : f32
    %5 = vector.broadcast %cst : f32 to vector<8x128xf32>
    %6 = arith.cmpf one, %4, %5 : vector<8x128xf32>
    %cst_4 = arith.constant 0.000000e+00 : f32
    %7 = vector.broadcast %cst_4 : f32 to vector<8x128xf32>
    %8 = arith.maximumf %3, %7 : vector<8x128xf32>
    %9 = arith.mulf %3, %4 : vector<8x128xf32>
    %10 = arith.subf %8, %9 : vector<8x128xf32>
    %11 = math.absf %3 : vector<8x128xf32>
    %cst_5 = arith.constant 0.000000e+00 : f32
    %12 = vector.broadcast %cst_5 : f32 to vector<8x128xf32>
    %13 = arith.subf %12, %11 : vector<8x128xf32>
    %14 = math.exp %13 : vector<8x128xf32>
    %15 = math.log1p %14 : vector<8x128xf32>
    %16 = arith.addf %10, %15 : vector<8x128xf32>
    %cst_6 = arith.constant 0.000000e+00 : f32
    %17 = vector.broadcast %cst_6 : f32 to vector<8x128xf32>
    %18 = arith.select %6, %16, %17 : vector<8x128xi1>, vector<8x128xf32>
    %c0_7 = arith.constant 0 : index
    %c0_8 = arith.constant 0 : index
    %19 = vector.load %arg4[%c0_7, %c0_8] : memref<8x128xf32, #tpu.memory_space<vmem>>, vector<8x128xf32>
    %20 = arith.addf %19, %18 : vector<8x128xf32>
    %c0_9 = arith.constant 0 : index
    %c0_10 = arith.constant 0 : index
    %21 = vector.load %arg4[%c0_9, %c0_10] : memref<8x128xf32, #tpu.memory_space<vmem>>, vector<8x128xf32>
    tpu.vector_store %arg4[%c0_9, %c0_10], %20 {strides = array<i32>} : memref<8x128xf32, #tpu.memory_space<vmem>>, vector<8x128xf32>,
    return
  }
  func.func @transform_0(%arg0: i32, %arg1: i32) -> (i32, i32) {
    %c0_i32 = arith.constant 0 : i32
    return %arg0, %arg1 : i32, i32
  }
  func.func @transform_1(%arg0: i32, %arg1: i32) -> (i32, i32) {
    %c0_i32 = arith.constant 0 : i32
    return %arg0, %arg1 : i32, i32
  }
  func.func @transform_2(%arg0: i32, %arg1: i32) -> (i32, i32) {
    %c0_i32 = arith.constant 0 : i32
    %c0_i32_0 = arith.constant 0 : i32
    return %arg0, %c0_i32 : i32, i32
  }
}

</mosaic_0001>

<bundles_post_ra>
// kernel: tpu_custom_call.1
= control target key start
LH: loop header
LB: loop body
LE: loop exit
PB: predicated region body
PF: predicated region fallthrough
CT: control target
= control target key end

     0   :  { %7 = vsyncpa [#allocation3], 0  ;;  %s750_s0 = inlined_call_operand.hbm [shape: f32[16,128], index: 0, kind: input, shape index: {}]   ;;  %s751_s1 = inlined_call_operand.hbm [shape: f32[16,128], index: 1, kind: input, shape index: {}]   ;;  %s752_s2 = inlined_call_operand.hbm [shape: f32[16,128], index: 2, kind: output, shape index: {}]  }
   0x1   :  { %9 = vsyncpa [#allocation3 + $0x1], 0 }
   0x2   :  { %10 = vsyncpa [#allocation6], 0 }
   0x3   :  { %12 = vsyncpa [#allocation6 + $0x1], 0 }
   0x4   :  { %13 = vsyncpa [#allocation4], 0 }
   0x5   :  { %15 = vsyncpa [#allocation4 + $0x1], 0  ;;  %s617_s9 = smov 0   ;;  %s619_s10 = smov 0  }
   0x6   :  { %s621_s11 = smov 0   ;;  %s623_s12 = smov 0  }
   0x7   :  { %s625_s13 = smov 0   ;;  %s627_s14 = smov 0  }
   0x8 LB: > { %s366_s15 = sadd.s32 4294967295, %s600_s14   ;;  %s367_s16 = sadd.s32 4294967294, %s600_s14   ;;  %s600_s14 = sphi %s627_s14, %s21_s14   ;;  %s596_s13 = sphi %s625_s13, %s761_s13   ;;  %s592_s12 = sphi %s623_s12, %s760_s12   ;;  %s588_s11 = sphi %s621_s11, %s759_s11   ;;  %s584_s10 = sphi %s619_s10, %s758_s10   ;;  %s580_s9 = sphi %s617_s9, %s757_s9  }
   0x9   : > { %s33_s17 = sadd.s32 1, %s596_s13  ;;  %s42_s18 = sadd.s32 1, %s588_s11 }
   0xa   : > { %p35_p0 = scmp.ge.s32.totalorder %s33_s17, 2  ;;  %p49_p1 = scmp.ne.s32.totalorder %s588_s11, %s584_s10 }
   0xb   : > { %p50_p2 = scmp.eq.s32.totalorder %s600_s14, 0  ;;  %p55_p3 = scmp.ne.s32.totalorder %s584_s10, %s580_s9 }
   0xc   : > { %s763_s17 = smov (%p35_p0, %s33_s17), 0  ;;  %p56_p5 = scmp.eq.s32.totalorder %s366_s15, 0 }
   0xd   : > { %p658_p4 = por %p50_p2, %p49_p1  ;;  %s37_s20 = ssub.s32 %s596_s13, %s763_s17 }
   0xe   : > { %p107_p6 = scmp.eq.s32.totalorder %s366_s15, 1  ;;  %p40_p7 = scmp.eq.s32.totalorder %s37_s20, 0 }
   0xf   : > { %p664_p8 = por %p56_p5, %p55_p3  ;;  %p113_p10 = scmp.eq.s32.totalorder %s367_s16, 1 }
  0x10   : > { %p668_p9 = por %p107_p6, %p49_p1  ;;  %p369_p12 = scmp.ge.s32.totalorder %s600_s14, 2 }
  0x11   : > { %s673_s23 = scalar_select %p40_p7, %s588_s11, %s42_s18  }
  0x12   : > { %p675_p11 = por %p113_p10, %p55_p3  ;;  %p399_p13 = scmp.lt.s32.totalorder %s600_s14, 2 }
  0x13   : > { %s133_s25 = sand.u32 1, %s588_s11   ;;  %s371_s27 = sshll.u32 %s596_s13, 3 }
  0x14   : > { %s370_s26 = sshll.u32 %s133_s25, 3  ;;  %s142_s30 = scalar_lea.hbm %s750_s0, %s371_s27 }
  0x15   : > { %s137_s3 = scalar_lea.vmem [#allocation2], %s370_s26  ;;  %s144_s5 = sshll.u32 %s142_s30, 4  ;;  %s145_s5 = int_to_ptr.hbm [resolvable:$true] %s144_s5 }
  0x16   : > { %s146_s4 = sshll.u32 %s137_s3, 4  ;;  %p389_p0 = pnand %p399_p13, %p658_p4  ;;  %s147_s4 = int_to_ptr.vmem [resolvable:$true] %s146_s4 }
  0x17   : > { %p374_p1 = scmp.ge.s32.totalorder %s600_s14, 1  ;;  %p171_p2 = scmp.lt.s32.totalorder %s600_s14, 3 }
  0x18   : > { %s134_s6 = scalar_lea.sflag [#allocation3], %s133_s25  ;;  %s162_s15 = scalar_lea.hbm %s751_s1, %s371_s27 }
  0x19   : > { %391 = dma.hbm_to_vmem [thread:$0]  (!%p389_p0), %s145_s5, 128, %s147_s4, %s134_s6  }
  0x1a   : > { %p172_p3 = pnand %p374_p1, %p171_p2  ;;  %s157_s16 = scalar_lea.vmem [#allocation5], %s370_s26 }
  0x1b   : > { %s166_s18 = sshll.u32 %s157_s16, 4  ;;  %s164_s20 = sshll.u32 %s162_s15, 4  ;;  %s167_s18 = int_to_ptr.vmem [resolvable:$true] %s166_s18  ;;  %s165_s20 = int_to_ptr.hbm [resolvable:$true] %s164_s20 }
  0x1c   : > { %s154_s28 = scalar_lea.sflag [#allocation6], %s133_s25  ;;  %175 = sbr.rel (%p172_p3) target bundleno = 68 (0x44), region = 28 }
  0x1d   : > { %394 = dma.hbm_to_vmem [thread:$0]  (!%p389_p0), %s165_s20, 128, %s167_s18, %s154_s28  }
  0x1e   : > { %s694_s19 = sand.u32 (!%p172_p3), 1, %s584_s10  }
  0x1f   : > { %s697_s29 = sshll.u32 (!%p172_p3), %s694_s19, 3  ;;  %s178_s30 = scalar_lea.sflag (!%p172_p3), [#allocation3], %s694_s19 }
  0x20   : > { %s181_s3 = scalar_lea.vmem (!%p172_p3), [#allocation2], %s697_s29 }
  0x21   : > { %567 = dma.done.wait (%p664_p8), %s178_s30, 128  }
  0x22   : > { %569 = vsyncadd (%p664_p8), %s178_s30, 4294967168  ;;  %s188_s25 = scalar_lea.sflag [#allocation6], %s694_s19  ;;  %s191_s26 = scalar_lea.vmem [#allocation5], %s697_s29 }
  0x23   : > { %571 = dma.done.wait (%p664_p8), %s188_s25, 128  }
  0x24   : > { %573 = vsyncadd (%p664_p8), %s188_s25, 4294967168  ;;  %v223_v0 = vld [vmem:[%s181_s3] sm:$0xff]  ;;  %v224_v7 = vld [vmem:[%s191_s26] sm:$0xff]  ;;  %s379_s27 = sshll.u32 %s592_s12, 3  ;;  %s217_s6 = scalar_lea.vmem [#allocation7], %s697_s29 }
  0x25   : > { %v229_v1 = vand.u32 2147483647, %v223_v0  ;;  %v226_v9 = vmax.f32 %v223_v0, 0.0  ;;  %v227_v10 = vmul.f32 %v224_v7, %v223_v0  ;;  %s258_s5 = scalar_lea.hbm %s752_s2, %s379_s27  ;;  %vm225_vm1 = vcmp.ne.f32.partialorder %v224_v7, -1.0  ;;  %s260_s7 = sshll.u32 %s217_s6, 4  ;;  %s261_s7 = int_to_ptr.vmem [resolvable:$true] %s260_s7 }
  0x26   : > { %s262_s8 = sshll.u32 %s258_s5, 4  ;;  %s248_s12 = scalar_lea.sflag [#allocation4], %s694_s19  ;;  %s263_s8 = int_to_ptr.hbm [resolvable:$true] %s262_s8 }
  0x27   : > { %v230_v2 = vsub.f32 0.0, %v229_v1  ;;  %v228_v14 = vsub.f32 %v226_v9, %v227_v10  ;;  %s528_s15 = sshra.s32 %s263_s8, 4  ;;  %s534_s28 = scalar_lea.hbm %s752_s2, 16  ;;  %s529_s15 = int_to_ptr.hbm [resolvable:$true] %s528_s15 }
  0x28   : > { %s530_s16 = scalar_lea.hbm %s529_s15, 8  ;;  %p535_p7 = scmp.lt.s32.totalorder %s529_s15, %s752_s2 }
  0x29   : > { %v231_v3 = vmul.f32 1.442695, %v230_v2  ;;  %p531_p4 = scmp.ne.s32.totalorder %s529_s15, %s530_s16  ;;  %p536_p8 = scmp.lt.s32.totalorder %s534_s28, %s530_s16 }
  0x2b   : > { %450 = vpow2.f32 %v231_v3  ;;  %p532_p5 = pnand %p531_p4, %p668_p9  ;;  %p537_p10 = por %p536_p8, %p535_p7 }
  0x2d   : > { %p533_p6 = pneg %p532_p5 }
  0x2f   : > { %p538_p13 = pnand %p537_p10, %p533_p6 }
  0x31   : > { %v451_v4 = vpop.eup %450 }
  0x32   : > { %v233_v5 = vadd.f32 1.0, %v451_v4  ;;  %v236_v6 = vmul.f32 -0.5, %v451_v4  ;;  %v239_v11 = vand.u32 2147483647, %v451_v4 }
  0x34   : > { %452 = vlog2.f32 %v233_v5  ;;  %v237_v8 = vadd.f32 1.0, %v236_v6  ;;  %vm240_vm0 = vcmp.lt.f32.partialorder %v239_v11, 0.0004427343 }
  0x36   : > { %v238_v12 = vmul.f32 %v451_v4, %v237_v8 }
  0x3a   : > { %v453_v13 = vpop.eup %452 }
  0x3b   : > { %v235_v15 = vmul.f32 0.6931472, %v453_v13 }
  0x3d   : > { %v241_v16 = vsel %vm240_vm0, %v238_v12, %v235_v15 }
  0x3e   : > { %v242_v17 = vadd.f32 %v241_v16, %v228_v14 }
  0x40   : > { %v243_v18 = vsel %vm225_vm1, %v242_v17, 0.0 }
  0x41   : > { %246 = vst [vmem:[%s217_s6] sm:$0xff] %v243_v18 }
  0x42   : > { %541 = shalt.err (!%p538_p13)
}
  0x43   : > { %386 = dma.vmem_to_hbm [thread:$0]  (%p668_p9), %s261_s7, 128, %s263_s8, %s248_s12  }
  0x44 PF: > { %s274_s19 = sand.u32 1, %s580_s9   ;;  %p396_p0 = pnand %p369_p12, %p675_p11 }
  0x45   : > { %s275_s3 = scalar_lea.sflag [#allocation4], %s274_s19 }
  0x46   : > { %p397_p1 = pneg %p396_p0 }
  0x48   : > { %575 = dma.done.wait (%p397_p1), %s275_s3, 128  }
  0x49   : > { %577 = vsyncadd (%p397_p1), %s275_s3, 4294967168  ;;  %s21_s14 = sadd.s32 1, %s600_s14   ;;  %s757_s9 = smov %s584_s10 }
  0x4a   : > { %p18_p2 = scmp.ge.s32.totalorder %s21_s14, 4   ;;  %s758_s10 = smov %s588_s11 }
  0x4b   : > { %s759_s11 = smov %s673_s23  ;;  %s760_s12 = smov %s596_s13 }
  0x4c   : > { %s761_s13 = smov %s763_s17  ;;  %20 = sbr.rel (!%p18_p2) target bundleno = 8 (0x8), region = 90 }
  0x51   :  { %281 = vsyncpa [#allocation3], 1 }
  0x52   :  { %283 = vsyncpa [#allocation3 + $0x1], 1 }
  0x53   :  { %284 = vsyncpa [#allocation6], 1 }
  0x54   :  { %286 = vsyncpa [#allocation6 + $0x1], 1 }
  0x55   :  { %287 = vsyncpa [#allocation4], 1 }
  0x56   :  { %289 = vsyncpa [#allocation4 + $0x1], 1 }

</bundles_post_ra>
